<compile_context>
chip_gen: v5e
topology: v5e:2x2
jax: 0.10.0
libtpu: 0.0.40
codegen_flags: <defaults>
</compile_context>

<pallas_src>
import jax
import jax.numpy as jnp
from jax.experimental import pallas as pl
from jax.experimental.pallas import tpu as pltpu


def _mlp_kernel(x_ref,
                w1_ref, b1_ref,
                w2_ref, b2_ref,
                w3_ref, b3_ref,
                wo_ref, bo_ref,
                o_ref):
    # Hoist biases once per grid step (f32).
    b1 = b1_ref[...]
    b2 = b2_ref[...]
    b3 = b3_ref[...]
    bo = bo_ref[...]

    # Activations arrive as bf16 (MXU-native). Accumulate in f32, do all
    # elementwise math (bias add, ReLU) in f32, cast back to bf16 only for
    # the next matmul.
    x = x_ref[...]

    h = jnp.dot(x, w1_ref[...], preferred_element_type=jnp.float32) + b1
    h = jnp.maximum(h, 0.0)

    h = jnp.dot(h.astype(jnp.bfloat16), w2_ref[...],
                preferred_element_type=jnp.float32) + b2
    h = jnp.maximum(h, 0.0)

    h = jnp.dot(h.astype(jnp.bfloat16), w3_ref[...],
                preferred_element_type=jnp.float32) + b3
    h = jnp.maximum(h, 0.0)

    out = jnp.dot(h.astype(jnp.bfloat16), wo_ref[...],
                  preferred_element_type=jnp.float32) + bo
    o_ref[...] = out.astype(o_ref.dtype)


def simple_nn_forward(x, params, *, tile_b=128):
    """x: (B, input_dim) float32. params: dict with f32 weights/biases.

    Returns (B, output_dim) float32 logits (bf16 matmul inputs, f32 accum).
    """
    w1 = params["w1"].astype(jnp.bfloat16)
    w2 = params["w2"].astype(jnp.bfloat16)
    w3 = params["w3"].astype(jnp.bfloat16)
    b1 = params["b1"].astype(jnp.float32)
    b2 = params["b2"].astype(jnp.float32)
    b3 = params["b3"].astype(jnp.float32)

    input_dim, hidden_dim = w1.shape
    out_dim = params["wo"].shape[1]

    # Lane-dense output slab: pad final layer to a multiple of 128 lanes.
    out_pad = max(128, pl.cdiv(out_dim, 128) * 128)
    wo = jnp.zeros((hidden_dim, out_pad), jnp.bfloat16)
    wo = wo.at[:, :out_dim].set(params["wo"].astype(jnp.bfloat16))
    bo = jnp.zeros((1, out_pad), jnp.float32)
    bo = bo.at[:, :out_dim].set(params["bo"].astype(jnp.float32))

    # Pad batch to a multiple of tile_b and cast activations to bf16.
    B = x.shape[0]
    b_padded = pl.cdiv(B, tile_b) * tile_b
    x_p = jnp.pad(x.astype(jnp.bfloat16), ((0, b_padded - B), (0, 0)))

    grid = (b_padded // tile_b,)

    def resident(a):  # whole array, VMEM-resident across all grid steps
        return pl.BlockSpec(a.shape, lambda i: (0,) * a.ndim)

    flops = 2 * b_padded * (input_dim * hidden_dim
                            + 2 * hidden_dim * hidden_dim
                            + hidden_dim * out_pad)
    bytes_accessed = (x_p.size * 2
                      + b_padded * out_pad * 4
                      + (w1.size + w2.size + w3.size + wo.size) * 2
                      + (b1.size + b2.size + b3.size + bo.size) * 4)

    out = pl.pallas_call(
        _mlp_kernel,
        out_shape=jax.ShapeDtypeStruct((b_padded, out_pad), jnp.float32),
        grid=grid,
        in_specs=[pl.BlockSpec((tile_b, input_dim), lambda i: (i, 0)),
                  resident(w1), resident(b1),
                  resident(w2), resident(b2),
                  resident(w3), resident(b3),
                  resident(wo), resident(bo)],
        out_specs=pl.BlockSpec((tile_b, out_pad), lambda i: (i, 0)),
        compiler_params=pltpu.CompilerParams(
            dimension_semantics=("parallel",)),
        cost_estimate=pl.CostEstimate(
            flops=flops, transcendentals=0, bytes_accessed=bytes_accessed),
    )(x_p, w1, b1, w2, b2, w3, b3, wo, bo)

    return out[:B, :out_dim]


def init_params(key, input_dim, hidden_dim, output_dim):
    """Deterministic synthetic init (uniform, PyTorch-style fan_in scaling)."""
    def linear(k, fan_in, fan_out):
        kw, kb = jax.random.split(k)
        bound = 1.0 / jnp.sqrt(fan_in)
        w = jax.random.uniform(kw, (fan_in, fan_out), jnp.float32, -bound, bound)
        b = jax.random.uniform(kb, (1, fan_out), jnp.float32, -bound, bound)
        return w, b

    k1, k2, k3, k4 = jax.random.split(key, 4)
    w1, b1 = linear(k1, input_dim, hidden_dim)
    w2, b2 = linear(k2, hidden_dim, hidden_dim)
    w3, b3 = linear(k3, hidden_dim, hidden_dim)
    wo, bo = linear(k4, hidden_dim, output_dim)
    return {"w1": w1, "b1": b1, "w2": w2, "b2": b2,
            "w3": w3, "b3": b3, "wo": wo, "bo": bo}


def ref_forward(x, params):
    """Plain-JAX reference using the same mixed precision (bf16 in, f32 acc)."""
    def lin(h, w, b):
        return jnp.dot(h.astype(jnp.bfloat16), w.astype(jnp.bfloat16),
                       preferred_element_type=jnp.float32) + b
    h = jnp.maximum(lin(x, params["w1"], params["b1"]), 0.0)
    h = jnp.maximum(lin(h, params["w2"], params["b2"]), 0.0)
    h = jnp.maximum(lin(h, params["w3"], params["b3"]), 0.0)
    return lin(h, params["wo"], params["bo"])


if __name__ == "__main__":
    # Synthetic sizes: checkpoint-derived input_dim / output_dim replaced by
    # small deterministic values (vectorizer vocab = 256 features, label
    # encoder = 16 classes), hidden_dim = 128 as in the module.
    batch = 8
    input_dim = 256
    hidden_dim = 128
    output_dim = 16

    key = jax.random.PRNGKey(0)
    kx, kp = jax.random.split(key)
    x = jax.random.normal(kx, (batch, input_dim), jnp.float32)
    params = init_params(kp, input_dim, hidden_dim, output_dim)

    out = simple_nn_forward(x, params)
    jax.block_until_ready(out)

    ref = ref_forward(x, params)
    assert out.shape == (batch, output_dim)
    assert jnp.allclose(out, ref, atol=1e-2, rtol=1e-2), (
        f"max abs err {jnp.max(jnp.abs(out - ref))}")

    print("KERNEL_OK")
</pallas_src>

<mosaic_0001>
module attributes {stable_mosaic.version = 11 : i64} {
  func.func @_mlp_kernel(%arg0: i32, %arg1: memref<128x256xbf16, #tpu.memory_space<vmem>>, %arg2: memref<256x128xbf16, #tpu.memory_space<vmem>>, %arg3: memref<1x128xf32, #tpu.memory_space<vmem>>, %arg4: memref<128x128xbf16, #tpu.memory_space<vmem>>, %arg5: memref<1x128xf32, #tpu.memory_space<vmem>>, %arg6: memref<128x128xbf16, #tpu.memory_space<vmem>>, %arg7: memref<1x128xf32, #tpu.memory_space<vmem>>, %arg8: memref<128x128xbf16, #tpu.memory_space<vmem>>, %arg9: memref<1x128xf32, #tpu.memory_space<vmem>>, %arg10: memref<128x128xf32, #tpu.memory_space<vmem>>) attributes {dimension_semantics = [#tpu.dimension_semantics<parallel>], iteration_bounds = array<i64: 1>, scalar_prefetch = 0 : i64, scratch_operands = 0 : i64, tpu.core_type = #tpu.core_type<tc>, window_params = [{transform_indices = @transform_0, window_bounds = array<i64: 128, 256>}, {pipeline_mode = #tpu.pipeline_mode<synchronous>, transform_indices = @transform_1, window_bounds = array<i64: 256, 128>}, {pipeline_mode = #tpu.pipeline_mode<synchronous>, transform_indices = @transform_2, window_bounds = array<i64: 1, 128>}, {pipeline_mode = #tpu.pipeline_mode<synchronous>, transform_indices = @transform_3, window_bounds = array<i64: 128, 128>}, {pipeline_mode = #tpu.pipeline_mode<synchronous>, transform_indices = @transform_4, window_bounds = array<i64: 1, 128>}, {pipeline_mode = #tpu.pipeline_mode<synchronous>, transform_indices = @transform_5, window_bounds = array<i64: 128, 128>}, {pipeline_mode = #tpu.pipeline_mode<synchronous>, transform_indices = @transform_6, window_bounds = array<i64: 1, 128>}, {pipeline_mode = #tpu.pipeline_mode<synchronous>, transform_indices = @transform_7, window_bounds = array<i64: 128, 128>}, {pipeline_mode = #tpu.pipeline_mode<synchronous>, transform_indices = @transform_8, window_bounds = array<i64: 1, 128>}, {transform_indices = @transform_9, window_bounds = array<i64: 128, 128>}]} {
    %c0 = arith.constant 0 : index
    %c0_0 = arith.constant 0 : index
    %0 = vector.load %arg3[%c0, %c0_0] : memref<1x128xf32, #tpu.memory_space<vmem>>, vector<1x128xf32>
    %c0_1 = arith.constant 0 : index
    %c0_2 = arith.constant 0 : index
    %1 = vector.load %arg5[%c0_1, %c0_2] : memref<1x128xf32, #tpu.memory_space<vmem>>, vector<1x128xf32>
    %c0_3 = arith.constant 0 : index
    %c0_4 = arith.constant 0 : index
    %2 = vector.load %arg7[%c0_3, %c0_4] : memref<1x128xf32, #tpu.memory_space<vmem>>, vector<1x128xf32>
    %c0_5 = arith.constant 0 : index
    %c0_6 = arith.constant 0 : index
    %3 = vector.load %arg9[%c0_5, %c0_6] : memref<1x128xf32, #tpu.memory_space<vmem>>, vector<1x128xf32>
    %c0_7 = arith.constant 0 : index
    %c0_8 = arith.constant 0 : index
    %4 = vector.load %arg1[%c0_7, %c0_8] : memref<128x256xbf16, #tpu.memory_space<vmem>>, vector<128x256xbf16>
    %c0_9 = arith.constant 0 : index
    %c0_10 = arith.constant 0 : index
    %5 = vector.load %arg2[%c0_9, %c0_10] : memref<256x128xbf16, #tpu.memory_space<vmem>>, vector<256x128xbf16>
    %cst = arith.constant dense<0.000000e+00> : vector<128x128xf32>
    %6 = tpu.matmul %4, %5, %cst {dimension_numbers = #tpu.dot_dimension_numbers<[1], [0], [0], [1], [0, 0, 1, 1], [], []>} : vector<128x256xbf16>, vector<256x128xbf16>, vector<128x128xf32> -> vector<128x128xf32>
    %7 = vector.broadcast %0 : vector<1x128xf32> to vector<128x128xf32>
    %8 = arith.addf %6, %7 : vector<128x128xf32>
    %cst_11 = arith.constant 0.000000e+00 : f32
    %9 = vector.broadcast %cst_11 : f32 to vector<128x128xf32>
    %10 = arith.maximumf %8, %9 : vector<128x128xf32>
    %11 = arith.truncf %10 : vector<128x128xf32> to vector<128x128xbf16>
    %c0_12 = arith.constant 0 : index
    %c0_13 = arith.constant 0 : index
    %12 = vector.load %arg4[%c0_12, %c0_13] : memref<128x128xbf16, #tpu.memory_space<vmem>>, vector<128x128xbf16>
    %cst_14 = arith.constant dense<0.000000e+00> : vector<128x128xf32>
    %13 = tpu.matmul %11, %12, %cst_14 {dimension_numbers = #tpu.dot_dimension_numbers<[1], [0], [0], [1], [0, 0, 1, 1], [], []>} : vector<128x128xbf16>, vector<128x128xbf16>, vector<128x128xf32> -> vector<128x128xf32>
    %14 = vector.broadcast %1 : vector<1x128xf32> to vector<128x128xf32>
    %15 = arith.addf %13, %14 : vector<128x128xf32>
    %cst_15 = arith.constant 0.000000e+00 : f32
    %16 = vector.broadcast %cst_15 : f32 to vector<128x128xf32>
    %17 = arith.maximumf %15, %16 : vector<128x128xf32>
    %18 = arith.truncf %17 : vector<128x128xf32> to vector<128x128xbf16>
    %c0_16 = arith.constant 0 : index
    %c0_17 = arith.constant 0 : index
    %19 = vector.load %arg6[%c0_16, %c0_17] : memref<128x128xbf16, #tpu.memory_space<vmem>>, vector<128x128xbf16>
    %cst_18 = arith.constant dense<0.000000e+00> : vector<128x128xf32>
    %20 = tpu.matmul %18, %19, %cst_18 {dimension_numbers = #tpu.dot_dimension_numbers<[1], [0], [0], [1], [0, 0, 1, 1], [], []>} : vector<128x128xbf16>, vector<128x128xbf16>, vector<128x128xf32> -> vector<128x128xf32>
    %21 = vector.broadcast %2 : vector<1x128xf32> to vector<128x128xf32>
    %22 = arith.addf %20, %21 : vector<128x128xf32>
    %cst_19 = arith.constant 0.000000e+00 : f32
    %23 = vector.broadcast %cst_19 : f32 to vector<128x128xf32>
    %24 = arith.maximumf %22, %23 : vector<128x128xf32>
    %25 = arith.truncf %24 : vector<128x128xf32> to vector<128x128xbf16>
    %c0_20 = arith.constant 0 : index
    %c0_21 = arith.constant 0 : index
    %26 = vector.load %arg8[%c0_20, %c0_21] : memref<128x128xbf16, #tpu.memory_space<vmem>>, vector<128x128xbf16>
    %cst_22 = arith.constant dense<0.000000e+00> : vector<128x128xf32>
    %27 = tpu.matmul %25, %26, %cst_22 {dimension_numbers = #tpu.dot_dimension_numbers<[1], [0], [0], [1], [0, 0, 1, 1], [], []>} : vector<128x128xbf16>, vector<128x128xbf16>, vector<128x128xf32> -> vector<128x128xf32>
    %28 = vector.broadcast %3 : vector<1x128xf32> to vector<128x128xf32>
    %29 = arith.addf %27, %28 : vector<128x128xf32>
    %c0_23 = arith.constant 0 : index
    %c0_24 = arith.constant 0 : index
    %30 = vector.load %arg10[%c0_23, %c0_24] : memref<128x128xf32, #tpu.memory_space<vmem>>, vector<128x128xf32>
    tpu.vector_store %arg10[%c0_23, %c0_24], %29 {strides = array<i32>} : memref<128x128xf32, #tpu.memory_space<vmem>>, vector<128x128xf32>,
    return
  }
  func.func @transform_0(%arg0: i32) -> (i32, i32) {
    %c0_i32 = arith.constant 0 : i32
    %c0_i32_0 = arith.constant 0 : i32
    return %arg0, %c0_i32 : i32, i32
  }
  func.func @transform_1(%arg0: i32) -> (i32, i32) {
    %c0_i32 = arith.constant 0 : i32
    %c0_i32_0 = arith.constant 0 : i32
    %c0_i32_1 = arith.constant 0 : i32
    return %c0_i32, %c0_i32_0 : i32, i32
  }
  func.func @transform_2(%arg0: i32) -> (i32, i32) {
    %c0_i32 = arith.constant 0 : i32
    %c0_i32_0 = arith.constant 0 : i32
    %c0_i32_1 = arith.constant 0 : i32
    return %c0_i32, %c0_i32_0 : i32, i32
  }
  func.func @transform_3(%arg0: i32) -> (i32, i32) {
    %c0_i32 = arith.constant 0 : i32
    %c0_i32_0 = arith.constant 0 : i32
    %c0_i32_1 = arith.constant 0 : i32
    return %c0_i32, %c0_i32_0 : i32, i32
  }
  func.func @transform_4(%arg0: i32) -> (i32, i32) {
    %c0_i32 = arith.constant 0 : i32
    %c0_i32_0 = arith.constant 0 : i32
    %c0_i32_1 = arith.constant 0 : i32
    return %c0_i32, %c0_i32_0 : i32, i32
  }
  func.func @transform_5(%arg0: i32) -> (i32, i32) {
    %c0_i32 = arith.constant 0 : i32
    %c0_i32_0 = arith.constant 0 : i32
    %c0_i32_1 = arith.constant 0 : i32
    return %c0_i32, %c0_i32_0 : i32, i32
  }
  func.func @transform_6(%arg0: i32) -> (i32, i32) {
    %c0_i32 = arith.constant 0 : i32
    %c0_i32_0 = arith.constant 0 : i32
    %c0_i32_1 = arith.constant 0 : i32
    return %c0_i32, %c0_i32_0 : i32, i32
  }
  func.func @transform_7(%arg0: i32) -> (i32, i32) {
    %c0_i32 = arith.constant 0 : i32
    %c0_i32_0 = arith.constant 0 : i32
    %c0_i32_1 = arith.constant 0 : i32
    return %c0_i32, %c0_i32_0 : i32, i32
  }
  func.func @transform_8(%arg0: i32) -> (i32, i32) {
    %c0_i32 = arith.constant 0 : i32
    %c0_i32_0 = arith.constant 0 : i32
    %c0_i32_1 = arith.constant 0 : i32
    return %c0_i32, %c0_i32_0 : i32, i32
  }
  func.func @transform_9(%arg0: i32) -> (i32, i32) {
    %c0_i32 = arith.constant 0 : i32
    %c0_i32_0 = arith.constant 0 : i32
    return %arg0, %c0_i32 : i32, i32
  }
}

</mosaic_0001>

<bundles_post_ra>
// kernel: tpu_custom_call.1
= control target key start
LH: loop header
LB: loop body
LE: loop exit
PB: predicated region body
PF: predicated region fallthrough
CT: control target
= control target key end

     0   :  { %14 = vsyncpa [#allocation3], 0  ;;  %s1511_s0 = inlined_call_operand.hbm [shape: bf16[128,256], index: 0, kind: input, shape index: {}]   ;;  %s1512_s1 = inlined_call_operand.hbm [shape: bf16[256,128], index: 1, kind: input, shape index: {}]   ;;  %s1513_s2 = inlined_call_operand.vmem [shape: f32[1,128], index: 2, kind: input, shape index: {}]   ;;  %s1514_s3 = inlined_call_operand.hbm [shape: bf16[128,128], index: 3, kind: input, shape index: {}]   ;;  %s1515_s4 = inlined_call_operand.vmem [shape: f32[1,128], index: 4, kind: input, shape index: {}]   ;;  %s1516_s5 = inlined_call_operand.hbm [shape: bf16[128,128], index: 5, kind: input, shape index: {}]   ;;  %s1517_s6 = inlined_call_operand.vmem [shape: f32[1,128], index: 6, kind: input, shape index: {}]   ;;  %s1518_s7 = inlined_call_operand.hbm [shape: bf16[128,128], index: 7, kind: input, shape index: {}]   ;;  %s1519_s8 = inlined_call_operand.vmem [shape: f32[1,128], index: 8, kind: input, shape index: {}]   ;;  %s1520_s9 = inlined_call_operand.hbm [shape: f32[128,128], index: 9, kind: output, shape index: {}]  }
   0x1   :  { %15 = vsyncpa [#allocation6], 0 }
   0x2   :  { %16 = vsyncpa [#allocation9], 0  ;;  %s35_s11 = sshll.u32 %s1512_s1, 4  ;;  %s36_s11 = int_to_ptr.hbm [resolvable:$true] %s35_s11 }
   0x3   :  { %17 = vsyncpa [#allocation4], 0  ;;  %s1367_s12 = smov [#allocation5]   ;;  %s65_s16 = sshll.u32 %s1516_s5, 4  ;;  %s66_s16 = int_to_ptr.hbm [resolvable:$true] %s65_s16 }
   0x4   :  { %s37_s13 = sshll.u32 %s1367_s12, 4  ;;  %s1368_s17 = smov 64   ;;  %s38_s13 = int_to_ptr.vmem [resolvable:$true] %s37_s13 }
   0x5   :  { %s1369_s18 = smov 4   ;;  %s1370_s19 = smov [#allocation8]  }
   0x6   :  { %43 = dma.hbm_to_vmem [thread:$0]  %s36_s11, 2048, %s38_s13, [#allocation6], %s1368_s17, %s1368_s17, %s1369_s18  }
   0x7   :  { %s67_s20 = sshll.u32 %s1370_s19, 4  ;;  %s22_s22 = sshll.u32 %s1511_s0, 4  ;;  %s68_s20 = int_to_ptr.vmem [resolvable:$true] %s67_s20  ;;  %s23_s22 = int_to_ptr.hbm [resolvable:$true] %s22_s22 }
   0x8   :  { %73 = dma.hbm_to_vmem [thread:$0]  %s66_s16, 1024, %s68_s20, [#allocation9], %s1368_s17, %s1368_s17, %s1369_s18  }
   0x9   :  { %s1371_s5 = smov [#allocation2]   ;;  %s50_s26 = sshll.u32 %s1514_s3, 4  ;;  %s51_s26 = int_to_ptr.hbm [resolvable:$true] %s50_s26 }
   0xa   :  { %s24_s23 = sshll.u32 %s1371_s5, 4  ;;  %s1372_s27 = smov 128   ;;  %s25_s23 = int_to_ptr.vmem [resolvable:$true] %s24_s23 }
   0xb   :  { %s1373_s28 = smov 8   ;;  %s1374_s0 = smov [#allocation7]  }
   0xc   :  { %30 = dma.hbm_to_vmem [thread:$0]  %s23_s22, 2048, %s25_s23, [#allocation3], %s1372_s27, %s1372_s27, %s1373_s28  }
   0xd   :  { %s52_s29 = sshll.u32 %s1374_s0, 4  ;;  %s80_s11 = sshll.u32 %s1518_s7, 4  ;;  %s53_s29 = int_to_ptr.vmem [resolvable:$true] %s52_s29  ;;  %s81_s11 = int_to_ptr.hbm [resolvable:$true] %s80_s11 }
   0xe   :  { %58 = dma.hbm_to_vmem [thread:$0]  %s51_s26, 1024, %s53_s29, [#allocation6], %s1368_s17, %s1368_s17, %s1369_s18  }
   0xf   :  { %s1375_s3 = smov [#allocation10]  }
  0x10   :  { %s82_s12 = sshll.u32 %s1375_s3, 4  ;;  %s83_s12 = int_to_ptr.vmem [resolvable:$true] %s82_s12 }
  0x11   :  { %88 = dma.hbm_to_vmem [thread:$0]  %s81_s11, 1024, %s83_s12, [#allocation9], %s1368_s17, %s1368_s17, %s1369_s18  }
  0x12   :  { %1359 = dma.done.wait [#allocation3], 2048  }
  0x13   :  { %1360 = vsyncadd [#allocation3], 4294965248 }
  0x14   :  { %1361 = dma.done.wait [#allocation6], 3072  }
  0x15   :  { %1362 = vsyncadd [#allocation6], 4294964224 }
  0x16   :  { %1363 = dma.done.wait [#allocation9], 2048  }
  0x17   :  { %1364 = vsyncadd [#allocation9], 4294965248  ;;  %v1144_v0 = vld [vmem:[#allocation5 + $0x38] sm:$0xff]  ;;  %v1143_v1 = vld [vmem:[#allocation5 + $0x30] sm:$0xff]  ;;  %s882_s20 = sshll.u32 %s1520_s9, 4  ;;  %s883_s20 = int_to_ptr.hbm [resolvable:$true] %s882_s20 }
  0x18   :  { %1177 = vmatpush.bf16.msra.mxu1 %v1144_v0  ;;  %342 = vmatpush.bf16.msra.mxu0 %v1144_v0  ;;  %v1142_v2 = vld [vmem:[#allocation5 + $0x28] sm:$0xff]  ;;  %v1141_v3 = vld [vmem:[#allocation5 + $0x20] sm:$0xff]  ;;  %v1140_v4 = vld [vmem:[#allocation5 + $0x18] sm:$0xff] }
  0x19   :  { %1178 = vmatpush.bf16.msra.mxu2 %v1144_v0  ;;  %1179 = vmatpush.bf16.msra.mxu3 %v1144_v0  ;;  %v1139_v5 = vld [vmem:[#allocation5 + $0x10] sm:$0xff]  ;;  %v1138_v6 = vld [vmem:[#allocation5 + $0x8] sm:$0xff]  ;;  %v1137_v7 = vld [vmem:[#allocation5] sm:$0xff] }
  0x1a   :  { %v915_v8 = vld [vmem:[#allocation2 + $0x20] sm:$0xf]  ;;  %v1126_v9 = vld [vmem:[#allocation2 + $0x24] sm:$0xf0]  ;;  %v1152_v12 = vld [vmem:[#allocation5 + $0x78] sm:$0xff] }
  0x1b   :  { %v899_v10 = vld [vmem:[#allocation2] sm:$0xf]  ;;  %v1122_v11 = vld [vmem:[#allocation2 + $0x4] sm:$0xf0]  ;;  %v916_v13 = vor.u32 %v1126_v9, %v915_v8  ;;  %v1151_v15 = vld [vmem:[#allocation5 + $0x70] sm:$0xff] }
  0x1c   :  { %1180 = vmatpush.bf16.msra.mxu1 %v1143_v1  ;;  %343 = vmatpush.bf16.msra.mxu0 %v1143_v1  ;;  %v900_v14 = vor.u32 %v1122_v11, %v899_v10  ;;  %v1150_v16 = vld [vmem:[#allocation5 + $0x68] sm:$0xff]  ;;  %v1149_v17 = vld [vmem:[#allocation5 + $0x60] sm:$0xff]  ;;  %v923_v18 = vld [vmem:[#allocation2 + $0x30] sm:$0xf] }
  0x1d   :  { %1181 = vmatpush.bf16.msra.mxu2 %v1143_v1  ;;  %1182 = vmatpush.bf16.msra.mxu3 %v1143_v1  ;;  %v1128_v19 = vld [vmem:[#allocation2 + $0x34] sm:$0xf0]  ;;  %v907_v20 = vld [vmem:[#allocation2 + $0x10] sm:$0xf]  ;;  %v1146_v26 = vld [vmem:[#allocation5 + $0x48] sm:$0xff] }
  0x1e   :  { %v1124_v21 = vld [vmem:[#allocation2 + $0x14] sm:$0xf0]  ;;  %v924_v23 = vor.u32 %v1128_v19, %v923_v18  ;;  %v1147_v25 = vld [vmem:[#allocation5 + $0x50] sm:$0xff]  ;;  %v1145_v27 = vld [vmem:[#allocation5 + $0x40] sm:$0xff] }
  0x1f   :  { %v1148_v22 = vld [vmem:[#allocation5 + $0x58] sm:$0xff]  ;;  %v908_v24 = vor.u32 %v1124_v21, %v907_v20  ;;  %v1121_v28 = vld [vmem:[#allocation2 + $0x4] sm:$0xf]  ;;  %v901_v29 = vld [vmem:[#allocation2 + $0x8] sm:$0xf0] }
  0x20   :  { %1183 = vmatpush.bf16.msra.mxu1 %v1142_v2  ;;  %344 = vmatpush.bf16.msra.mxu0 %v1142_v2  ;;  %v904_v30 = vor.u32 %v1121_v28, %v901_v29  ;;  %v931_v31 = vld [vmem:[#allocation2 + $0x40] sm:$0xf]  ;;  %v1130_v32 = vld [vmem:[#allocation2 + $0x44] sm:$0xf0]  ;;  %v1123_v34 = vld [vmem:[#allocation2 + $0x14] sm:$0xf] }
  0x21   :  { %1184 = vmatpush.bf16.msra.mxu2 %v1142_v2  ;;  %1185 = vmatpush.bf16.msra.mxu3 %v1142_v2  ;;  %v932_v33 = vor.u32 %v1130_v32, %v931_v31  ;;  %v909_v35 = vld [vmem:[#allocation2 + $0x18] sm:$0xf0]  ;;  %v939_v37 = vld [vmem:[#allocation2 + $0x50] sm:$0xf]  ;;  %v1132_v38 = vld [vmem:[#allocation2 + $0x54] sm:$0xf0] }
  0x22   :  { %v912_v36 = vor.u32 %v1123_v34, %v909_v35  ;;  %v940_v39 = vor.u32 %v1132_v38, %v939_v37  ;;  %v1125_v40 = vld [vmem:[#allocation2 + $0x24] sm:$0xf]  ;;  %v917_v41 = vld [vmem:[#allocation2 + $0x28] sm:$0xf0]  ;;  %v947_v43 = vld [vmem:[#allocation2 + $0x60] sm:$0xf] }
  0x23   :  { %v920_v42 = vor.u32 %v1125_v40, %v917_v41  ;;  %v1134_v44 = vld [vmem:[#allocation2 + $0x64] sm:$0xf0]  ;;  %v1127_v46 = vld [vmem:[#allocation2 + $0x34] sm:$0xf]  ;;  %v925_v47 = vld [vmem:[#allocation2 + $0x38] sm:$0xf0] }
  0x24   :  { %1186 = vmatpush.bf16.msra.mxu1 %v1141_v3  ;;  %345 = vmatpush.bf16.msra.mxu0 %v1141_v3  ;;  %v948_v45 = vor.u32 %v1134_v44, %v947_v43  ;;  %v928_v48 = vor.u32 %v1127_v46, %v925_v47  ;;  %v1129_v49 = vld [vmem:[#allocation2 + $0x44] sm:$0xf]  ;;  %v933_v50 = vld [vmem:[#allocation2 + $0x48] sm:$0xf0]  ;;  %v955_v52 = vld [vmem:[#allocation2 + $0x70] sm:$0xf] }
  0x25   :  { %1187 = vmatpush.bf16.msra.mxu2 %v1141_v3  ;;  %1188 = vmatpush.bf16.msra.mxu3 %v1141_v3  ;;  %v936_v51 = vor.u32 %v1129_v49, %v933_v50  ;;  %v1136_v53 = vld [vmem:[#allocation2 + $0x74] sm:$0xf0]  ;;  %v1131_v56 = vld [vmem:[#allocation2 + $0x54] sm:$0xf]  ;;  %v941_v57 = vld [vmem:[#allocation2 + $0x58] sm:$0xf0] }
  0x26   :  { %v956_v54 = vor.u32 %v1136_v53, %v955_v52  ;;  %v1160_v55 = vld [vmem:[#allocation7 + $0x38] sm:$0xff]  ;;  %v944_v58 = vor.u32 %v1131_v56, %v941_v57  ;;  %v1159_v59 = vld [vmem:[#allocation7 + $0x30] sm:$0xff]  ;;  %v1158_v60 = vld [vmem:[#allocation7 + $0x28] sm:$0xff] }
  0x27   :  { %v1157_v61 = vld [vmem:[#allocation7 + $0x20] sm:$0xff]  ;;  %v949_v63 = vld [vmem:[#allocation2 + $0x68] sm:$0xf0]  ;;  %v1156_v0 = vld [vmem:[#allocation7 + $0x18] sm:$0xff] }
  0x28   :  { %1189 = vmatpush.bf16.msra.mxu1 %v1140_v4  ;;  %346 = vmatpush.bf16.msra.mxu0 %v1140_v4  ;;  %v1133_v62 = vld [vmem:[#allocation2 + $0x64] sm:$0xf]  ;;  %v1155_v3 = vld [vmem:[#allocation7 + $0x10] sm:$0xff]  ;;  %v957_v8 = vld [vmem:[#allocation2 + $0x78] sm:$0xf0] }
  0x29   :  { %1190 = vmatpush.bf16.msra.mxu2 %v1140_v4  ;;  %1191 = vmatpush.bf16.msra.mxu3 %v1140_v4  ;;  %v952_v1 = vor.u32 %v1133_v62, %v949_v63  ;;  %v1154_v4 = vld [vmem:[#allocation7 + $0x8] sm:$0xff] }
  0x2c   :  { %1192 = vmatpush.bf16.msra.mxu1 %v1139_v5  ;;  %347 = vmatpush.bf16.msra.mxu0 %v1139_v5 }
  0x2d   :  { %1193 = vmatpush.bf16.msra.mxu2 %v1139_v5  ;;  %1194 = vmatpush.bf16.msra.mxu3 %v1139_v5 }
  0x30   :  { %1195 = vmatpush.bf16.msra.mxu1 %v1138_v6  ;;  %348 = vmatpush.bf16.msra.mxu0 %v1138_v6 }
  0x31   :  { %1196 = vmatpush.bf16.msra.mxu2 %v1138_v6  ;;  %1197 = vmatpush.bf16.msra.mxu3 %v1138_v6  ;;  %v1153_v6 = vld [vmem:[#allocation7] sm:$0xff] }
  0x34   :  { %1198 = vmatpush.bf16.msra.mxu1 %v1137_v7  ;;  %349 = vmatpush.bf16.msra.mxu0 %v1137_v7 }
  0x35   :  { %1199 = vmatpush.bf16.msra.mxu2 %v1137_v7  ;;  %1200 = vmatpush.bf16.msra.mxu3 %v1137_v7  ;;  %v1135_v7 = vld [vmem:[#allocation2 + $0x74] sm:$0xf] }
  0x36   :  { %v960_v9 = vor.u32 %v1135_v7, %v957_v8 }
  0x37   :  { %360 = vmatmul.bf16.vlgmr.msra.gmra.mxu1 %v916_v13  ;;  %350 = vmatmul.bf16.vlgmr.msra.gmra.mxu0 %v900_v14 }
  0x38   :  { %391 = vmatpush.bf16.msrb.mxu1 %v1152_v12  ;;  %370 = vmatmul.bf16.vlgmr.msra.gmra.mxu2 %v932_v33 }
  0x39   :  { %380 = vmatmul.bf16.vlgmr.msra.gmra.mxu3 %v948_v45  ;;  %531 = vmatpush.bf16.msrb.mxu2 %v1160_v55 }
  0x3c   :  { %392 = vmatpush.bf16.msrb.mxu1 %v1151_v15  ;;  %v1460_v15 = vld [vmem:[%s1513_s2] ss:$0 sm:$0xff] }
  0x3d   :  { %532 = vmatpush.bf16.msrb.mxu2 %v1159_v59 }
  0x40   :  { %393 = vmatpush.bf16.msrb.mxu1 %v1150_v16 }
  0x41   :  { %533 = vmatpush.bf16.msrb.mxu2 %v1158_v60 }
  0x44   :  { %394 = vmatpush.bf16.msrb.mxu1 %v1149_v17 }
  0x45   :  { %534 = vmatpush.bf16.msrb.mxu2 %v1157_v61 }
  0x47   :  { %365 = vmatmul.bf16.gmra.mxu1 %v924_v23  ;;  %355 = vmatmul.bf16.gmra.mxu0 %v908_v24 }
  0x48   :  { %395 = vmatpush.bf16.msrb.mxu1 %v1148_v22  ;;  %375 = vmatmul.bf16.gmra.mxu2 %v940_v39 }
  0x49   :  { %385 = vmatmul.bf16.gmra.mxu3 %v956_v54  ;;  %535 = vmatpush.bf16.msrb.mxu2 %v1156_v0 }
  0x4c   :  { %396 = vmatpush.bf16.msrb.mxu1 %v1147_v25 }
  0x4d   :  { %536 = vmatpush.bf16.msrb.mxu2 %v1155_v3 }
  0x50   :  { %397 = vmatpush.bf16.msrb.mxu1 %v1146_v26 }
  0x51   :  { %537 = vmatpush.bf16.msrb.mxu2 %v1154_v4 }
  0x54   :  { %398 = vmatpush.bf16.msrb.mxu1 %v1145_v27 }
  0x55   :  { %538 = vmatpush.bf16.msrb.mxu2 %v1153_v6 }
  0x57   :  { %399 = vmatmul.bf16.vlgmr.msrb.gmra.mxu1 %v904_v30 }
  0x67   :  { %404 = vmatmul.bf16.gmra.mxu1 %v912_v36 }
  0x77   :  { %409 = vmatmul.bf16.gmra.mxu1 %v920_v42 }
  0x87   :  { %414 = vmatmul.bf16.gmra.mxu1 %v928_v48 }
  0x97   :  { %419 = vmatmul.bf16.gmra.mxu1 %v936_v51 }
  0xa7   :  { %424 = vmatmul.bf16.gmra.mxu1 %v944_v58 }
  0xb4   :  { %v361_v2 = vpop.f32.mrf.mxu1  ;;  %v351_v11 = vpop.f32.mrf.mxu0 }
  0xb5   :  { %v352_v16 = vadd.f32 %v1460_v15, %v351_v11  ;;  %v362_v36 = vadd.f32 %v1460_v15, %v361_v2 }
  0xb7   :  { %429 = vmatmul.bf16.gmra.mxu1 %v952_v1 }
  0xbb   :  { %v371_v46 = vpop.f32.mrf.mxu2 }
  0xbc   :  { %v363_v5 = vpop.f32.mrf.mxu1  ;;  %v353_v13 = vpop.f32.mrf.mxu0  ;;  %v372_v56 = vadd.f32 %v1460_v15, %v371_v46 }
  0xbd   :  { %v354_v17 = vadd.f32 %v1460_v15, %v353_v13  ;;  %v364_v37 = vadd.f32 %v1460_v15, %v363_v5  ;;  %v381_v4 = vpop.f32.mrf.mxu3 }
  0xc3   :  { %v373_v54 = vpop.f32.mrf.mxu2 }
  0xc4   :  { %v366_v10 = vpop.f32.mrf.mxu1  ;;  %v356_v21 = vpop.f32.mrf.mxu0  ;;  %v374_v57 = vadd.f32 %v1460_v15, %v373_v54 }
  0xc5   :  { %v357_v26 = vadd.f32 %v1460_v15, %v356_v21  ;;  %v367_v45 = vadd.f32 %v1460_v15, %v366_v10  ;;  %v383_v13 = vpop.f32.mrf.mxu3 }
  0xc7   :  { %434 = vmatmul.bf16.gmra.mxu1 %v960_v9 }
  0xcb   :  { %v376_v61 = vpop.f32.mrf.mxu2 }
  0xcc   :  { %v368_v12 = vpop.f32.mrf.mxu1  ;;  %v358_v27 = vpop.f32.mrf.mxu0  ;;  %v377_v2 = vadd.f32 %v1460_v15, %v376_v61 }
  0xcd   :  { %v359_v28 = vadd.f32 %v1460_v15, %v358_v27  ;;  %v369_v47 = vadd.f32 %v1460_v15, %v368_v12  ;;  %v1168_v12 = vld [vmem:[#allocation8 + $0x38] sm:$0xff] }
  0xce   :  { %671 = vmatpush.bf16.msrb.mxu3 %v1168_v12 }
  0xd3   :  { %v378_v3 = vpop.f32.mrf.mxu2 }
  0xd4   :  { %v400_v14 = vpop.f32.mrf.mxu1  ;;  %v379_v5 = vadd.f32 %v1460_v15, %v378_v3 }
  0xd5   :  { %v401_v18 = vadd.f32 %v400_v14, %v352_v16  ;;  %v1167_v16 = vld [vmem:[#allocation8 + $0x30] sm:$0xff] }
  0xd6   :  { %672 = vmatpush.bf16.msrb.mxu3 %v1167_v16 }
  0xd7   :  { %v440_v22 = vmax.f32 %v401_v18, 0.0  ;;  %v1166_v18 = vld [vmem:[#allocation8 + $0x28] sm:$0xff] }
  0xda   :  { %673 = vmatpush.bf16.msrb.mxu3 %v1166_v18 }
  0xdc   :  { %v402_v19 = vpop.f32.mrf.mxu1 }
  0xdd   :  { %v403_v20 = vadd.f32 %v402_v19, %v354_v17  ;;  %v382_v17 = vadd.f32 %v1460_v15, %v381_v4  ;;  %v384_v19 = vadd.f32 %v1460_v15, %v383_v13 }
  0xdf   :  { %v441_v23 = vmax.f32 %v403_v20, 0.0 }
  0xe1   :  { %v456_v24 = vpack.c.bf16 %v441_v23, %v440_v22  ;;  %v1165_v23 = vld [vmem:[#allocation8 + $0x20] sm:$0xff] }
  0xe2   :  { %674 = vmatpush.bf16.msrb.mxu3 %v1165_v23  ;;  %v1175_v23 = vld [vmem:[#allocation10 + $0x30] sm:$0xff] }
  0xe3   :  { %539 = vmatmul.bf16.vlgmr.msrb.gmra.mxu2 %v456_v24  ;;  %v386_v24 = vpop.f32.mrf.mxu3 }
  0xe4   :  { %v405_v25 = vpop.f32.mrf.mxu1 }
  0xe5   :  { %v406_v29 = vadd.f32 %v405_v25, %v357_v26 }
  0xe7   :  { %v442_v32 = vmax.f32 %v406_v29, 0.0 }
  0xec   :  { %v407_v30 = vpop.f32.mrf.mxu1 }
  0xed   :  { %v408_v31 = vadd.f32 %v407_v30, %v359_v28  ;;  %v1164_v28 = vld [vmem:[#allocation8 + $0x18] sm:$0xff]  ;;  %v387_v30 = vadd.f32 %v1460_v15, %v386_v24  ;;  %v1174_v24 = vld [vmem:[#allocation10 + $0x28] sm:$0xff] }
  0xee   :  { %675 = vmatpush.bf16.msrb.mxu3 %v1164_v28  ;;  %v1173_v28 = vld [vmem:[#allocation10 + $0x20] sm:$0xff] }
  0xef   :  { %v443_v33 = vmax.f32 %v408_v31, 0.0  ;;  %v388_v31 = vpop.f32.mrf.mxu3 }
  0xf1   :  { %v457_v34 = vpack.c.bf16 %v443_v33, %v442_v32  ;;  %v1163_v32 = vld [vmem:[#allocation8 + $0x10] sm:$0xff]  ;;  %v1162_v33 = vld [vmem:[#allocation8 + $0x8] sm:$0xff] }
  0xf2   :  { %676 = vmatpush.bf16.msrb.mxu3 %v1163_v32  ;;  %v1172_v32 = vld [vmem:[#allocation10 + $0x18] sm:$0xff] }
  0xf3   :  { %544 = vmatmul.bf16.gmra.mxu2 %v457_v34  ;;  %v389_v34 = vadd.f32 %v1460_v15, %v388_v31 }
  0xf4   :  { %v410_v35 = vpop.f32.mrf.mxu1 }
  0xf5   :  { %v411_v38 = vadd.f32 %v410_v35, %v362_v36 }
  0xf6   :  { %677 = vmatpush.bf16.msrb.mxu3 %v1162_v33 }
  0xf7   :  { %v444_v41 = vmax.f32 %v411_v38, 0.0 }
  0xfc   :  { %v412_v39 = vpop.f32.mrf.mxu1 }
  0xfd   :  { %v413_v40 = vadd.f32 %v412_v39, %v364_v37 }
  0xff   :  { %v445_v42 = vmax.f32 %v413_v40, 0.0  ;;  %v1161_v40 = vld [vmem:[#allocation8] sm:$0xff] }
 0x100   :  { %678 = vmatpush.bf16.msrb.mxu3 %v1161_v40 }
 0x101   :  { %v458_v43 = vpack.c.bf16 %v445_v42, %v444_v41 }
 0x103   :  { %549 = vmatmul.bf16.gmra.mxu2 %v458_v43  ;;  %v1481_v43 = vld [vmem:[%s1515_s4] ss:$0 sm:$0xff] }
 0x104   :  { %v415_v44 = vpop.f32.mrf.mxu1 }
 0x105   :  { %v416_v48 = vadd.f32 %v415_v44, %v367_v45 }
 0x107   :  { %v446_v51 = vmax.f32 %v416_v48, 0.0 }
 0x10c   :  { %v417_v49 = vpop.f32.mrf.mxu1 }
 0x10d   :  { %v418_v50 = vadd.f32 %v417_v49, %v369_v47 }
 0x10f   :  { %v447_v52 = vmax.f32 %v418_v50, 0.0 }
 0x111   :  { %v459_v53 = vpack.c.bf16 %v447_v52, %v446_v51 }
 0x113   :  { %554 = vmatmul.bf16.gmra.mxu2 %v459_v53 }
 0x114   :  { %v420_v55 = vpop.f32.mrf.mxu1 }
 0x115   :  { %v421_v58 = vadd.f32 %v420_v55, %v372_v56 }
 0x117   :  { %v448_v62 = vmax.f32 %v421_v58, 0.0 }
 0x11c   :  { %v422_v59 = vpop.f32.mrf.mxu1 }
 0x11d   :  { %v423_v60 = vadd.f32 %v422_v59, %v374_v57 }
 0x11f   :  { %v449_v63 = vmax.f32 %v423_v60, 0.0 }
 0x121   :  { %v460_v0 = vpack.c.bf16 %v449_v63, %v448_v62 }
 0x123   :  { %559 = vmatmul.bf16.gmra.mxu2 %v460_v0 }
 0x124   :  { %v425_v1 = vpop.f32.mrf.mxu1 }
 0x125   :  { %v426_v6 = vadd.f32 %v425_v1, %v377_v2 }
 0x127   :  { %v450_v9 = vmax.f32 %v426_v6, 0.0 }
 0x12c   :  { %v427_v7 = vpop.f32.mrf.mxu1 }
 0x12d   :  { %v428_v8 = vadd.f32 %v427_v7, %v379_v5 }
 0x12f   :  { %v451_v10 = vmax.f32 %v428_v8, 0.0 }
 0x131   :  { %v461_v11 = vpack.c.bf16 %v451_v10, %v450_v9 }
 0x133   :  { %564 = vmatmul.bf16.gmra.mxu2 %v461_v11 }
 0x134   :  { %v430_v14 = vpop.f32.mrf.mxu1 }
 0x135   :  { %v431_v20 = vadd.f32 %v430_v14, %v382_v17 }
 0x137   :  { %v452_v25 = vmax.f32 %v431_v20, 0.0 }
 0x13c   :  { %v432_v21 = vpop.f32.mrf.mxu1 }
 0x13d   :  { %v433_v22 = vadd.f32 %v432_v21, %v384_v19  ;;  %v1176_v21 = vld [vmem:[#allocation10 + $0x38] sm:$0xff] }
 0x13e   :  { %811 = vmatpush.bf16.msrb.mxu0 %v1176_v21 }
 0x13f   :  { %v453_v26 = vmax.f32 %v433_v22, 0.0 }
 0x141   :  { %v462_v27 = vpack.c.bf16 %v453_v26, %v452_v25 }
 0x142   :  { %812 = vmatpush.bf16.msrb.mxu0 %v1175_v23 }
 0x143   :  { %569 = vmatmul.bf16.gmra.mxu2 %v462_v27 }
 0x144   :  { %v435_v29 = vpop.f32.mrf.mxu1 }
 0x145   :  { %v436_v35 = vadd.f32 %v435_v29, %v387_v30 }
 0x146   :  { %813 = vmatpush.bf16.msrb.mxu0 %v1174_v24 }
 0x147   :  { %v454_v38 = vmax.f32 %v436_v35, 0.0  ;;  %v1170_v35 = vld [vmem:[#allocation10 + $0x8] sm:$0xff] }
 0x14a   :  { %814 = vmatpush.bf16.msrb.mxu0 %v1173_v28 }
 0x14c   :  { %v437_v36 = vpop.f32.mrf.mxu1 }
 0x14d   :  { %v438_v37 = vadd.f32 %v437_v36, %v389_v34  ;;  %v1171_v34 = vld [vmem:[#allocation10 + $0x10] sm:$0xff] }
 0x14e   :  { %815 = vmatpush.bf16.msrb.mxu0 %v1172_v32 }
 0x14f   :  { %v455_v39 = vmax.f32 %v438_v37, 0.0 }
 0x151   :  { %v463_v41 = vpack.c.bf16 %v455_v39, %v454_v38 }
 0x152   :  { %816 = vmatpush.bf16.msrb.mxu0 %v1171_v34 }
 0x153   :  { %574 = vmatmul.bf16.gmra.mxu2 %v463_v41  ;;  %v1169_v41 = vld [vmem:[#allocation10] sm:$0xff] }
 0x156   :  { %817 = vmatpush.bf16.msrb.mxu0 %v1170_v35 }
 0x15a   :  { %818 = vmatpush.bf16.msrb.mxu0 %v1169_v41 }
 0x166   :  { %v540_v42 = vpop.f32.mrf.mxu2 }
 0x167   :  { %v541_v44 = vadd.f32 %v1481_v43, %v540_v42 }
 0x169   :  { %v580_v46 = vmax.f32 %v541_v44, 0.0 }
 0x16e   :  { %v542_v45 = vpop.f32.mrf.mxu2 }
 0x16f   :  { %v543_v15 = vadd.f32 %v1481_v43, %v542_v45  ;;  %v1213_v45 = vld [vmem:[%s1517_s6] ss:$0 sm:$0xff] }
 0x171   :  { %v581_v47 = vmax.f32 %v543_v15, 0.0 }
 0x173   :  { %v596_v48 = vpack.c.bf16 %v581_v47, %v580_v46 }
 0x175   :  { %679 = vmatmul.bf16.vlgmr.msrb.gmra.mxu3 %v596_v48 }
 0x176   :  { %v545_v49 = vpop.f32.mrf.mxu2 }
 0x177   :  { %v546_v50 = vadd.f32 %v1481_v43, %v545_v49 }
 0x179   :  { %v582_v53 = vmax.f32 %v546_v50, 0.0 }
 0x17e   :  { %v547_v51 = vpop.f32.mrf.mxu2 }
 0x17f   :  { %v548_v52 = vadd.f32 %v1481_v43, %v547_v51 }
 0x181   :  { %v583_v54 = vmax.f32 %v548_v52, 0.0 }
 0x183   :  { %v597_v55 = vpack.c.bf16 %v583_v54, %v582_v53 }
 0x185   :  { %684 = vmatmul.bf16.gmra.mxu3 %v597_v55 }
 0x186   :  { %v550_v56 = vpop.f32.mrf.mxu2 }
 0x187   :  { %v551_v57 = vadd.f32 %v1481_v43, %v550_v56 }
 0x189   :  { %v584_v60 = vmax.f32 %v551_v57, 0.0 }
 0x18e   :  { %v552_v58 = vpop.f32.mrf.mxu2 }
 0x18f   :  { %v553_v59 = vadd.f32 %v1481_v43, %v552_v58 }
 0x191   :  { %v585_v61 = vmax.f32 %v553_v59, 0.0 }
 0x193   :  { %v598_v62 = vpack.c.bf16 %v585_v61, %v584_v60 }
 0x195   :  { %689 = vmatmul.bf16.gmra.mxu3 %v598_v62 }
 0x196   :  { %v555_v63 = vpop.f32.mrf.mxu2 }
 0x197   :  { %v556_v0 = vadd.f32 %v1481_v43, %v555_v63 }
 0x199   :  { %v586_v3 = vmax.f32 %v556_v0, 0.0 }
 0x19e   :  { %v557_v1 = vpop.f32.mrf.mxu2 }
 0x19f   :  { %v558_v2 = vadd.f32 %v1481_v43, %v557_v1 }
 0x1a1   :  { %v587_v4 = vmax.f32 %v558_v2, 0.0 }
 0x1a3   :  { %v599_v5 = vpack.c.bf16 %v587_v4, %v586_v3 }
 0x1a5   :  { %694 = vmatmul.bf16.gmra.mxu3 %v599_v5 }
 0x1a6   :  { %v560_v6 = vpop.f32.mrf.mxu2 }
 0x1a7   :  { %v561_v7 = vadd.f32 %v1481_v43, %v560_v6 }
 0x1a9   :  { %v588_v10 = vmax.f32 %v561_v7, 0.0 }
 0x1ae   :  { %v562_v8 = vpop.f32.mrf.mxu2 }
 0x1af   :  { %v563_v9 = vadd.f32 %v1481_v43, %v562_v8 }
 0x1b1   :  { %v589_v11 = vmax.f32 %v563_v9, 0.0 }
 0x1b3   :  { %v600_v12 = vpack.c.bf16 %v589_v11, %v588_v10 }
 0x1b5   :  { %699 = vmatmul.bf16.gmra.mxu3 %v600_v12 }
 0x1b6   :  { %v565_v13 = vpop.f32.mrf.mxu2 }
 0x1b7   :  { %v566_v14 = vadd.f32 %v1481_v43, %v565_v13 }
 0x1b9   :  { %v590_v18 = vmax.f32 %v566_v14, 0.0 }
 0x1be   :  { %v567_v16 = vpop.f32.mrf.mxu2 }
 0x1bf   :  { %v568_v17 = vadd.f32 %v1481_v43, %v567_v16 }
 0x1c1   :  { %v591_v19 = vmax.f32 %v568_v17, 0.0 }
 0x1c3   :  { %v601_v20 = vpack.c.bf16 %v591_v19, %v590_v18 }
 0x1c5   :  { %704 = vmatmul.bf16.gmra.mxu3 %v601_v20 }
 0x1c6   :  { %v570_v22 = vpop.f32.mrf.mxu2 }
 0x1c7   :  { %v571_v25 = vadd.f32 %v1481_v43, %v570_v22 }
 0x1c9   :  { %v592_v29 = vmax.f32 %v571_v25, 0.0 }
 0x1ce   :  { %v572_v26 = vpop.f32.mrf.mxu2 }
 0x1cf   :  { %v573_v27 = vadd.f32 %v1481_v43, %v572_v26 }
 0x1d1   :  { %v593_v30 = vmax.f32 %v573_v27, 0.0 }
 0x1d3   :  { %v602_v31 = vpack.c.bf16 %v593_v30, %v592_v29 }
 0x1d5   :  { %709 = vmatmul.bf16.gmra.mxu3 %v602_v31 }
 0x1d6   :  { %v575_v33 = vpop.f32.mrf.mxu2 }
 0x1d7   :  { %v576_v36 = vadd.f32 %v1481_v43, %v575_v33 }
 0x1d9   :  { %v594_v39 = vmax.f32 %v576_v36, 0.0  ;;  %v1214_v36 = vld [vmem:[%s1519_s8] ss:$0 sm:$0xff]  ;;  %s1376_s8 = smov [#allocation11]  }
 0x1da   :  { %s880_s17 = sshll.u32 %s1376_s8, 4  ;;  %s881_s17 = int_to_ptr.vmem [resolvable:$true] %s880_s17 }
 0x1de   :  { %v577_v37 = vpop.f32.mrf.mxu2 }
 0x1df   :  { %v578_v38 = vadd.f32 %v1481_v43, %v577_v37 }
 0x1e1   :  { %v595_v40 = vmax.f32 %v578_v38, 0.0 }
 0x1e3   :  { %v603_v42 = vpack.c.bf16 %v595_v40, %v594_v39 }
 0x1e5   :  { %714 = vmatmul.bf16.gmra.mxu3 %v603_v42 }
 0x1f8   :  { %v680_v44 = vpop.f32.mrf.mxu3 }
 0x1f9   :  { %v681_v15 = vadd.f32 %v1213_v45, %v680_v44 }
 0x1fb   :  { %v720_v48 = vmax.f32 %v681_v15, 0.0 }
 0x200   :  { %v682_v46 = vpop.f32.mrf.mxu3 }
 0x201   :  { %v683_v47 = vadd.f32 %v1213_v45, %v682_v46 }
 0x203   :  { %v721_v49 = vmax.f32 %v683_v47, 0.0 }
 0x205   :  { %v736_v50 = vpack.c.bf16 %v721_v49, %v720_v48 }
 0x207   :  { %819 = vmatmul.bf16.vlgmr.msrb.gmra.mxu0 %v736_v50 }
 0x208   :  { %v685_v43 = vpop.f32.mrf.mxu3 }
 0x209   :  { %v686_v51 = vadd.f32 %v1213_v45, %v685_v43 }
 0x20b   :  { %v722_v54 = vmax.f32 %v686_v51, 0.0 }
 0x210   :  { %v687_v52 = vpop.f32.mrf.mxu3 }
 0x211   :  { %v688_v53 = vadd.f32 %v1213_v45, %v687_v52 }
 0x213   :  { %v723_v55 = vmax.f32 %v688_v53, 0.0 }
 0x215   :  { %v737_v56 = vpack.c.bf16 %v723_v55, %v722_v54 }
 0x217   :  { %824 = vmatmul.bf16.gmra.mxu0 %v737_v56 }
 0x218   :  { %v690_v57 = vpop.f32.mrf.mxu3 }
 0x219   :  { %v691_v58 = vadd.f32 %v1213_v45, %v690_v57 }
 0x21b   :  { %v724_v61 = vmax.f32 %v691_v58, 0.0 }
 0x220   :  { %v692_v59 = vpop.f32.mrf.mxu3 }
 0x221   :  { %v693_v60 = vadd.f32 %v1213_v45, %v692_v59 }
 0x223   :  { %v725_v62 = vmax.f32 %v693_v60, 0.0 }
 0x225   :  { %v738_v63 = vpack.c.bf16 %v725_v62, %v724_v61 }
 0x227   :  { %829 = vmatmul.bf16.gmra.mxu0 %v738_v63 }
 0x228   :  { %v695_v0 = vpop.f32.mrf.mxu3 }
 0x229   :  { %v696_v1 = vadd.f32 %v1213_v45, %v695_v0 }
 0x22b   :  { %v726_v4 = vmax.f32 %v696_v1, 0.0 }
 0x230   :  { %v697_v2 = vpop.f32.mrf.mxu3 }
 0x231   :  { %v698_v3 = vadd.f32 %v1213_v45, %v697_v2 }
 0x233   :  { %v727_v5 = vmax.f32 %v698_v3, 0.0 }
 0x235   :  { %v739_v6 = vpack.c.bf16 %v727_v5, %v726_v4 }
 0x237   :  { %834 = vmatmul.bf16.gmra.mxu0 %v739_v6 }
 0x238   :  { %v700_v7 = vpop.f32.mrf.mxu3 }
 0x239   :  { %v701_v8 = vadd.f32 %v1213_v45, %v700_v7 }
 0x23b   :  { %v728_v11 = vmax.f32 %v701_v8, 0.0 }
 0x240   :  { %v702_v9 = vpop.f32.mrf.mxu3 }
 0x241   :  { %v703_v10 = vadd.f32 %v1213_v45, %v702_v9 }
 0x243   :  { %v729_v12 = vmax.f32 %v703_v10, 0.0 }
 0x245   :  { %v740_v13 = vpack.c.bf16 %v729_v12, %v728_v11 }
 0x247   :  { %839 = vmatmul.bf16.gmra.mxu0 %v740_v13 }
 0x248   :  { %v705_v14 = vpop.f32.mrf.mxu3 }
 0x249   :  { %v706_v16 = vadd.f32 %v1213_v45, %v705_v14 }
 0x24b   :  { %v730_v19 = vmax.f32 %v706_v16, 0.0 }
 0x250   :  { %v707_v17 = vpop.f32.mrf.mxu3 }
 0x251   :  { %v708_v18 = vadd.f32 %v1213_v45, %v707_v17 }
 0x253   :  { %v731_v20 = vmax.f32 %v708_v18, 0.0 }
 0x255   :  { %v741_v21 = vpack.c.bf16 %v731_v20, %v730_v19 }
 0x257   :  { %844 = vmatmul.bf16.gmra.mxu0 %v741_v21 }
 0x258   :  { %v710_v22 = vpop.f32.mrf.mxu3 }
 0x259   :  { %v711_v23 = vadd.f32 %v1213_v45, %v710_v22 }
 0x25b   :  { %v732_v26 = vmax.f32 %v711_v23, 0.0 }
 0x260   :  { %v712_v24 = vpop.f32.mrf.mxu3 }
 0x261   :  { %v713_v25 = vadd.f32 %v1213_v45, %v712_v24 }
 0x263   :  { %v733_v27 = vmax.f32 %v713_v25, 0.0 }
 0x265   :  { %v742_v28 = vpack.c.bf16 %v733_v27, %v732_v26 }
 0x267   :  { %849 = vmatmul.bf16.gmra.mxu0 %v742_v28 }
 0x268   :  { %v715_v29 = vpop.f32.mrf.mxu3 }
 0x269   :  { %v716_v30 = vadd.f32 %v1213_v45, %v715_v29 }
 0x26b   :  { %v734_v33 = vmax.f32 %v716_v30, 0.0 }
 0x270   :  { %v717_v31 = vpop.f32.mrf.mxu3 }
 0x271   :  { %v718_v32 = vadd.f32 %v1213_v45, %v717_v31 }
 0x273   :  { %v735_v34 = vmax.f32 %v718_v32, 0.0 }
 0x275   :  { %v743_v35 = vpack.c.bf16 %v735_v34, %v734_v33 }
 0x277   :  { %854 = vmatmul.bf16.gmra.mxu0 %v743_v35 }
 0x284   :  { %v820_v37 = vpop.f32.mrf.mxu0 }
 0x285   :  { %v821_v38 = vadd.f32 %v1214_v36, %v820_v37 }
 0x287   :  { %860 = vst [vmem:[#allocation11] sm:$0xff] %v821_v38 }
 0x28c   :  { %v822_v39 = vpop.f32.mrf.mxu0 }
 0x28d   :  { %v823_v40 = vadd.f32 %v1214_v36, %v822_v39 }
 0x28f   :  { %861 = vst [vmem:[#allocation11 + $0x8] sm:$0xff] %v823_v40 }
 0x294   :  { %v825_v41 = vpop.f32.mrf.mxu0 }
 0x295   :  { %v826_v42 = vadd.f32 %v1214_v36, %v825_v41 }
 0x297   :  { %862 = vst [vmem:[#allocation11 + $0x10] sm:$0xff] %v826_v42 }
 0x29c   :  { %v827_v44 = vpop.f32.mrf.mxu0 }
 0x29d   :  { %v828_v15 = vadd.f32 %v1214_v36, %v827_v44 }
 0x29f   :  { %863 = vst [vmem:[#allocation11 + $0x18] sm:$0xff] %v828_v15 }
 0x2a4   :  { %v830_v45 = vpop.f32.mrf.mxu0 }
 0x2a5   :  { %v831_v46 = vadd.f32 %v1214_v36, %v830_v45 }
 0x2a7   :  { %864 = vst [vmem:[#allocation11 + $0x20] sm:$0xff] %v831_v46 }
 0x2ac   :  { %v832_v47 = vpop.f32.mrf.mxu0 }
 0x2ad   :  { %v833_v48 = vadd.f32 %v1214_v36, %v832_v47 }
 0x2af   :  { %865 = vst [vmem:[#allocation11 + $0x28] sm:$0xff] %v833_v48 }
 0x2b4   :  { %v835_v49 = vpop.f32.mrf.mxu0 }
 0x2b5   :  { %v836_v50 = vadd.f32 %v1214_v36, %v835_v49 }
 0x2b7   :  { %866 = vst [vmem:[#allocation11 + $0x30] sm:$0xff] %v836_v50 }
 0x2bc   :  { %v837_v43 = vpop.f32.mrf.mxu0 }
 0x2bd   :  { %v838_v51 = vadd.f32 %v1214_v36, %v837_v43 }
 0x2bf   :  { %867 = vst [vmem:[#allocation11 + $0x38] sm:$0xff] %v838_v51 }
 0x2c4   :  { %v840_v52 = vpop.f32.mrf.mxu0 }
 0x2c5   :  { %v841_v53 = vadd.f32 %v1214_v36, %v840_v52 }
 0x2c7   :  { %868 = vst [vmem:[#allocation11 + $0x40] sm:$0xff] %v841_v53 }
 0x2cc   :  { %v842_v54 = vpop.f32.mrf.mxu0 }
 0x2cd   :  { %v843_v55 = vadd.f32 %v1214_v36, %v842_v54 }
 0x2cf   :  { %869 = vst [vmem:[#allocation11 + $0x48] sm:$0xff] %v843_v55 }
 0x2d4   :  { %v845_v56 = vpop.f32.mrf.mxu0 }
 0x2d5   :  { %v846_v57 = vadd.f32 %v1214_v36, %v845_v56 }
 0x2d7   :  { %870 = vst [vmem:[#allocation11 + $0x50] sm:$0xff] %v846_v57 }
 0x2dc   :  { %v847_v58 = vpop.f32.mrf.mxu0 }
 0x2dd   :  { %v848_v59 = vadd.f32 %v1214_v36, %v847_v58 }
 0x2df   :  { %871 = vst [vmem:[#allocation11 + $0x58] sm:$0xff] %v848_v59 }
 0x2e4   :  { %v850_v60 = vpop.f32.mrf.mxu0 }
 0x2e5   :  { %v851_v61 = vadd.f32 %v1214_v36, %v850_v60 }
 0x2e7   :  { %872 = vst [vmem:[#allocation11 + $0x60] sm:$0xff] %v851_v61 }
 0x2ec   :  { %v852_v62 = vpop.f32.mrf.mxu0 }
 0x2ed   :  { %v853_v63 = vadd.f32 %v1214_v36, %v852_v62 }
 0x2ef   :  { %873 = vst [vmem:[#allocation11 + $0x68] sm:$0xff] %v853_v63 }
 0x2f4   :  { %v855_v0 = vpop.f32.mrf.mxu0 }
 0x2f5   :  { %v856_v1 = vadd.f32 %v1214_v36, %v855_v0 }
 0x2f7   :  { %874 = vst [vmem:[#allocation11 + $0x70] sm:$0xff] %v856_v1 }
 0x2fc   :  { %v857_v2 = vpop.f32.mrf.mxu0 }
 0x2fd   :  { %v858_v3 = vadd.f32 %v1214_v36, %v857_v2 }
 0x2ff   :  { %875 = vst [vmem:[#allocation11 + $0x78] sm:$0xff] %v858_v3 }
 0x300   :  { %888 = dma.vmem_to_hbm [thread:$0]  %s881_s17, 2048, %s883_s20, [#allocation4], %s1372_s27, %s1372_s27, %s1373_s28  }
 0x301   :  { %1365 = dma.done.wait [#allocation4], 2048  }
 0x302   :  { %1366 = vsyncadd [#allocation4], 4294965248 }
 0x303   :  { %893 = vsyncpa [#allocation3], 1 }
 0x304   :  { %894 = vsyncpa [#allocation6], 1 }
 0x305   :  { %895 = vsyncpa [#allocation9], 1 }
 0x306   :  { %896 = vsyncpa [#allocation4], 1 }

</bundles_post_ra>
